<compile_context>
chip_gen: v6e
topology: v6e:2x2x1
jax: 0.10.0
libtpu: 0.0.40
codegen_flags: <defaults>
</compile_context>

<pallas_src>
import math
import jax
import jax.numpy as jnp
import numpy as np
from jax import lax
from jax.experimental import pallas as pl
from jax.experimental.pallas import tpu as pltpu

# ----- config (small, consistent with the module) -----
B, S, H = 2, 8, 32          # batch, seq_len, hidden_size
NH, KVH = 4, 2              # num_attention_heads, num_key_value_heads
D = H // NH                 # head_dim = 8
KVD = KVH * D               # kv projection width = 16
QKW = H + KVD               # fused q+k width = 48
I = 64                      # intermediate_size
EPS = 1e-6                  # rms_norm_eps
THETA = 10000.0             # rope_theta
N_REP = NH // KVH           # GQA repeat factor = 2
PACK_W = 128                # padded fused projection width (2*QKW + KVD = 112 -> 128)
# TODO(synk): attention_dropout is ignored (p = 0.0 / inference semantics).


def decoder_kernel(x_ref, cs_ref, mask_ref, wqkv_ref, bqkv_ref, wo_ref,
                   wgu_ref, wd_ref, o_ref):
    x = x_ref[...]                                      # (S, H) f32, residual

    # ---- input RMSNorm (ln weight pre-folded into wqkv rows) ----
    var = jnp.mean(x * x, axis=-1, keepdims=True)
    h = (x * lax.rsqrt(var + EPS)).astype(jnp.bfloat16)

    # ---- fused QKV projection, columns [qk | rotate_half(qk) | v | pad] ----
    # (rotate_half and 1/sqrt(D) already folded into the weights / bias)
    qkv = jnp.dot(h, wqkv_ref[...],
                  preferred_element_type=jnp.float32) + bqkv_ref[...]   # (S, 128)

    # ---- RoPE: one 96-lane multiply by [cos|sin] and one add ----
    rot = qkv[:, :2 * QKW] * cs_ref[...]                # (S, 96)
    roped = rot[:, :QKW] + rot[:, QKW:2 * QKW]          # (S, 48) = [q*scale | k] roped
    vmat = qkv[:, 2 * QKW:2 * QKW + KVD]                # (S, 16)

    # ---- GQA attention: all heads in one batched einsum (batch = kv groups) ----
    qg = jnp.concatenate(
        [jnp.concatenate(
            [roped[:, (g * N_REP + r) * D:(g * N_REP + r + 1) * D]
             for r in range(N_REP)], axis=0)[None]
         for g in range(KVH)], axis=0)                   # (KVH, N_REP*S, D)
    kg = jnp.concatenate(
        [roped[:, H + g * D:H + (g + 1) * D][None] for g in range(KVH)],
        axis=0)                                          # (KVH, S, D)
    vg = jnp.concatenate(
        [vmat[:, g * D:(g + 1) * D][None] for g in range(KVH)],
        axis=0)                                          # (KVH, S, D)

    sc = jnp.einsum("gqd,gkd->gqk",
                    qg.astype(jnp.bfloat16), kg.astype(jnp.bfloat16),
                    preferred_element_type=jnp.float32) + mask_ref[...]
    sc = sc - jnp.max(sc, axis=-1, keepdims=True)
    p = jnp.exp(sc)
    p = p * pl.reciprocal(jnp.sum(p, axis=-1, keepdims=True), approx=True)
    og = jnp.einsum("gqk,gkd->gqd",
                    p.astype(jnp.bfloat16), vg.astype(jnp.bfloat16),
                    preferred_element_type=jnp.float32)  # (KVH, N_REP*S, D)

    # unpack back to (S, H), head-major (head h = g*N_REP + r)
    attn = jnp.concatenate(
        [og[g, r * S:(r + 1) * S, :] for g in range(KVH) for r in range(N_REP)],
        axis=-1)                                         # (S, H)

    # ---- o_proj (single dot) + residual 1 ----
    h1 = x + jnp.dot(attn.astype(jnp.bfloat16), wo_ref[...],
                     preferred_element_type=jnp.float32)

    # ---- post_attention RMSNorm (ln weight pre-folded into wgu rows) ----
    var2 = jnp.mean(h1 * h1, axis=-1, keepdims=True)
    h2 = (h1 * lax.rsqrt(var2 + EPS)).astype(jnp.bfloat16)

    # ---- MLP: down( silu(gate(x)) * up(x) ), gate|up fused (128-wide) ----
    gu = jnp.dot(h2, wgu_ref[...], preferred_element_type=jnp.float32)  # (S, 2I)
    g = gu[:, :I]
    u = gu[:, I:]
    act = g * pl.reciprocal(1.0 + jnp.exp(-g), approx=True)             # SiLU
    dwn = jnp.dot((act * u).astype(jnp.bfloat16), wd_ref[...],
                  preferred_element_type=jnp.float32)

    # ---- residual 2 ----
    o_ref[...] = (h1 + dwn).astype(o_ref.dtype)


def _rotate_half_perm(width, head_dim):
    """Signed block-diag permutation P with (x @ P) == rotate_half(x) per head."""
    p = np.zeros((width, width), np.float32)
    half = head_dim // 2
    for base in range(0, width, head_dim):
        for c in range(half):
            p[base + c + half, base + c] = -1.0   # out[c]        = -x[c + half]
            p[base + c, base + c + half] = 1.0    # out[c + half] =  x[c]
    return jnp.asarray(p)


def _pack_weights(p):
    """Fold RMSNorm weights, the 1/sqrt(D) score scale and rotate_half into the
    projection weights; cast all MXU operands to bf16."""
    scale = 1.0 / math.sqrt(D)
    wqk = jnp.concatenate([p["wq_t"] * scale, p["wk_t"]], axis=1)       # (H, 48)
    bqk = jnp.concatenate([p["bq"] * scale, p["bk"]], axis=1)           # (1, 48)
    rotp = _rotate_half_perm(QKW, D)
    wqk_rot = wqk @ rotp                                                # (H, 48)
    bqk_rot = bqk @ rotp                                                # (1, 48)
    padw = jnp.zeros((H, PACK_W - 2 * QKW - KVD), jnp.float32)
    padb = jnp.zeros((1, PACK_W - 2 * QKW - KVD), jnp.float32)
    wqkv = jnp.concatenate([wqk, wqk_rot, p["wv_t"], padw], axis=1)     # (H, 128)
    wqkv = (p["ln1"].reshape(H, 1) * wqkv).astype(jnp.bfloat16)         # fold ln1
    bqkv = jnp.concatenate([bqk, bqk_rot, p["bv"], padb], axis=1)       # (1, 128) f32
    wgu = jnp.concatenate([p["wg_t"], p["wu_t"]], axis=1)               # (H, 128)
    wgu = (p["ln2"].reshape(H, 1) * wgu).astype(jnp.bfloat16)           # fold ln2
    return (wqkv, bqkv, p["wo_t"].astype(jnp.bfloat16), wgu,
            p["wd_t"].astype(jnp.bfloat16))


def qwen2_decoder_layer(x, mask, cos, sin, params):
    """x: (B,S,H) fp32; mask: (S,S) additive causal; cos/sin: (S,D)."""
    wqkv, bqkv, wo, wgu, wd = _pack_weights(params)
    x2d = x.reshape(B * S, H)
    # [cos|sin] tiled per head block (NH q-heads + KVH kv-heads): (S, 96)
    cs = jnp.concatenate([jnp.tile(cos, (1, NH + KVH)),
                          jnp.tile(sin, (1, NH + KVH))], axis=1)
    mask_rep = jnp.tile(mask, (N_REP, 1))                               # (N_REP*S, S)

    out2d = pl.pallas_call(
        decoder_kernel,
        out_shape=jax.ShapeDtypeStruct((B * S, H), jnp.float32),
        grid=(B,),
        in_specs=[
            pl.BlockSpec((S, H), lambda b: (b, 0)),            # x row block (per batch)
            pl.BlockSpec((S, 2 * QKW), lambda b: (0, 0)),      # [cos|sin] table
            pl.BlockSpec((N_REP * S, S), lambda b: (0, 0)),    # causal mask (rep-tiled)
            pl.BlockSpec((H, PACK_W), lambda b: (0, 0)),       # fused qkv weight
            pl.BlockSpec((1, PACK_W), lambda b: (0, 0)),       # fused qkv bias
            pl.BlockSpec((H, H), lambda b: (0, 0)),            # o_proj weight
            pl.BlockSpec((H, 2 * I), lambda b: (0, 0)),        # gate|up weight
            pl.BlockSpec((I, H), lambda b: (0, 0)),            # down weight
        ],
        out_specs=pl.BlockSpec((S, H), lambda b: (b, 0)),
        compiler_params=pltpu.CompilerParams(
            dimension_semantics=("parallel",)),
    )(x2d, cs, mask_rep, wqkv, bqkv, wo, wgu, wd)
    return out2d.reshape(B, S, H)


# ---------------- pure-JAX reference (mirrors the PyTorch module) ----------------
def reference(x, mask, cos, sin, p):
    def rmsnorm(h, w):
        v = jnp.mean(h * h, axis=-1, keepdims=True)
        return w[0] * (h * lax.rsqrt(v + EPS))

    def rot_half(t):
        return jnp.concatenate([-t[..., D // 2:], t[..., :D // 2]], axis=-1)

    h = rmsnorm(x, p["ln1"])
    q = h @ p["wq_t"] + p["bq"][0]
    k = h @ p["wk_t"] + p["bk"][0]
    v = h @ p["wv_t"] + p["bv"][0]
    q = q.reshape(B, S, NH, D).transpose(0, 2, 1, 3)
    k = k.reshape(B, S, KVH, D).transpose(0, 2, 1, 3)
    v = v.reshape(B, S, KVH, D).transpose(0, 2, 1, 3)
    c = cos[None, None]
    s = sin[None, None]
    q = q * c + rot_half(q) * s
    k = k * c + rot_half(k) * s
    k = jnp.repeat(k, N_REP, axis=1)
    v = jnp.repeat(v, N_REP, axis=1)
    sc = jnp.einsum("bhqd,bhkd->bhqk", q, k) / math.sqrt(D) + mask[None, None]
    pw = jax.nn.softmax(sc, axis=-1)
    ao = jnp.einsum("bhqk,bhkd->bhqd", pw, v)
    ao = ao.transpose(0, 2, 1, 3).reshape(B, S, H) @ p["wo_t"]
    h1 = x + ao
    h2 = rmsnorm(h1, p["ln2"])
    g = h2 @ p["wg_t"]
    u = h2 @ p["wu_t"]
    return h1 + (jax.nn.silu(g) * u) @ p["wd_t"]


if __name__ == "__main__":
    key = jax.random.PRNGKey(0)
    keys = jax.random.split(key, 12)

    def w(k, shape, std=0.02):
        return (std * jax.random.normal(k, shape)).astype(jnp.float32)

    params = {
        "ln1": jnp.ones((1, H), jnp.float32) + w(keys[0], (1, H), 0.1),
        "wq_t": w(keys[1], (H, H)),
        "bq": w(keys[2], (1, H)),
        "wk_t": w(keys[3], (H, KVD)),
        "bk": w(keys[4], (1, KVD)),
        "wv_t": w(keys[5], (H, KVD)),
        "bv": w(keys[6], (1, KVD)),
        "wo_t": w(keys[7], (H, H)),
        "ln2": jnp.ones((1, H), jnp.float32) + w(keys[8], (1, H), 0.1),
        "wg_t": w(keys[9], (H, I)),
        "wu_t": w(keys[10], (H, I)),
        "wd_t": w(keys[11], (I, H)),
    }

    x = jax.random.normal(jax.random.PRNGKey(42), (B, S, H), jnp.float32)

    # rotary position embeddings, shared across batch: (S, D)
    inv_freq = 1.0 / (THETA ** (jnp.arange(0, D, 2, dtype=jnp.float32) / D))
    pos = jnp.arange(S, dtype=jnp.float32)
    freqs = pos[:, None] * inv_freq[None, :]
    emb = jnp.concatenate([freqs, freqs], axis=-1)
    cos = jnp.cos(emb)
    sin = jnp.sin(emb)

    # additive causal mask: (S, S), 0 allowed, -1e9 masked
    tri = jnp.tril(jnp.ones((S, S), bool))
    mask = jnp.where(tri, 0.0, -1e9).astype(jnp.float32)

    out = qwen2_decoder_layer(x, mask, cos, sin, params)
    out = jax.block_until_ready(out)

    ref = reference(x, mask, cos, sin, params)
    np.testing.assert_allclose(np.asarray(out), np.asarray(ref),
                               rtol=5e-2, atol=5e-2)
    print("KERNEL_OK")
</pallas_src>

<mosaic_0001>
module attributes {stable_mosaic.version = 11 : i64} {
  func.func @decoder_kernel(%arg0: i32, %arg1: memref<8x32xf32, #tpu.memory_space<vmem>>, %arg2: memref<8x96xf32, #tpu.memory_space<vmem>>, %arg3: memref<16x8xf32, #tpu.memory_space<vmem>>, %arg4: memref<32x128xbf16, #tpu.memory_space<vmem>>, %arg5: memref<1x128xf32, #tpu.memory_space<vmem>>, %arg6: memref<32x32xbf16, #tpu.memory_space<vmem>>, %arg7: memref<32x128xbf16, #tpu.memory_space<vmem>>, %arg8: memref<64x32xbf16, #tpu.memory_space<vmem>>, %arg9: memref<8x32xf32, #tpu.memory_space<vmem>>) attributes {dimension_semantics = [#tpu.dimension_semantics<parallel>], iteration_bounds = array<i64: 2>, scalar_prefetch = 0 : i64, scratch_operands = 0 : i64, tpu.core_type = #tpu.core_type<tc>, window_params = [{transform_indices = @transform_0, window_bounds = array<i64: 8, 32>}, {pipeline_mode = #tpu.pipeline_mode<synchronous>, transform_indices = @transform_1, window_bounds = array<i64: 8, 96>}, {pipeline_mode = #tpu.pipeline_mode<synchronous>, transform_indices = @transform_2, window_bounds = array<i64: 16, 8>}, {pipeline_mode = #tpu.pipeline_mode<synchronous>, transform_indices = @transform_3, window_bounds = array<i64: 32, 128>}, {pipeline_mode = #tpu.pipeline_mode<synchronous>, transform_indices = @transform_4, window_bounds = array<i64: 1, 128>}, {pipeline_mode = #tpu.pipeline_mode<synchronous>, transform_indices = @transform_5, window_bounds = array<i64: 32, 32>}, {pipeline_mode = #tpu.pipeline_mode<synchronous>, transform_indices = @transform_6, window_bounds = array<i64: 32, 128>}, {pipeline_mode = #tpu.pipeline_mode<synchronous>, transform_indices = @transform_7, window_bounds = array<i64: 64, 32>}, {transform_indices = @transform_8, window_bounds = array<i64: 8, 32>}]} {
    %c0 = arith.constant 0 : index
    %c0_0 = arith.constant 0 : index
    %0 = vector.load %arg1[%c0, %c0_0] : memref<8x32xf32, #tpu.memory_space<vmem>>, vector<8x32xf32>
    %1 = arith.mulf %0, %0 : vector<8x32xf32>
    %cst = arith.constant dense<0.000000e+00> : vector<8xf32>
    %2 = vector.multi_reduction <add>, %1, %cst [1] : vector<8x32xf32> to vector<8xf32>
    %3 = vector.shape_cast %2 : vector<8xf32> to vector<8x1xf32>
    %cst_1 = arith.constant 3.200000e+01 : f32
    %4 = vector.broadcast %cst_1 : f32 to vector<8x1xf32>
    %5 = arith.divf %3, %4 : vector<8x1xf32>
    %cst_2 = arith.constant 9.99999997E-7 : f32
    %6 = vector.broadcast %cst_2 : f32 to vector<8x1xf32>
    %7 = arith.addf %5, %6 : vector<8x1xf32>
    %8 = math.rsqrt %7 : vector<8x1xf32>
    %9 = vector.broadcast %8 : vector<8x1xf32> to vector<8x32xf32>
    %10 = arith.mulf %0, %9 : vector<8x32xf32>
    %11 = arith.truncf %10 : vector<8x32xf32> to vector<8x32xbf16>
    %c0_3 = arith.constant 0 : index
    %c0_4 = arith.constant 0 : index
    %12 = vector.load %arg4[%c0_3, %c0_4] : memref<32x128xbf16, #tpu.memory_space<vmem>>, vector<32x128xbf16>
    %cst_5 = arith.constant dense<0.000000e+00> : vector<8x128xf32>
    %13 = tpu.matmul %11, %12, %cst_5 {dimension_numbers = #tpu.dot_dimension_numbers<[1], [0], [0], [1], [0, 0, 1, 1], [], []>} : vector<8x32xbf16>, vector<32x128xbf16>, vector<8x128xf32> -> vector<8x128xf32>
    %c0_6 = arith.constant 0 : index
    %c0_7 = arith.constant 0 : index
    %14 = vector.load %arg5[%c0_6, %c0_7] : memref<1x128xf32, #tpu.memory_space<vmem>>, vector<1x128xf32>
    %15 = vector.broadcast %14 : vector<1x128xf32> to vector<8x128xf32>
    %16 = arith.addf %13, %15 : vector<8x128xf32>
    %17 = vector.extract_strided_slice %16 {offsets = [0, 0], sizes = [8, 96], strides = [1, 1]} : vector<8x128xf32> to vector<8x96xf32>
    %c0_8 = arith.constant 0 : index
    %c0_9 = arith.constant 0 : index
    %18 = vector.load %arg2[%c0_8, %c0_9] : memref<8x96xf32, #tpu.memory_space<vmem>>, vector<8x96xf32>
    %19 = arith.mulf %17, %18 : vector<8x96xf32>
    %20 = vector.extract_strided_slice %19 {offsets = [0, 0], sizes = [8, 48], strides = [1, 1]} : vector<8x96xf32> to vector<8x48xf32>
    %21 = vector.extract_strided_slice %19 {offsets = [0, 48], sizes = [8, 48], strides = [1, 1]} : vector<8x96xf32> to vector<8x48xf32>
    %22 = arith.addf %20, %21 : vector<8x48xf32>
    %23 = vector.extract_strided_slice %16 {offsets = [0, 96], sizes = [8, 16], strides = [1, 1]} : vector<8x128xf32> to vector<8x16xf32>
    %24 = vector.extract_strided_slice %22 {offsets = [0, 0], sizes = [8, 8], strides = [1, 1]} : vector<8x48xf32> to vector<8x8xf32>
    %25 = vector.extract_strided_slice %22 {offsets = [0, 8], sizes = [8, 8], strides = [1, 1]} : vector<8x48xf32> to vector<8x8xf32>
    %26 = tpu.concatenate %24, %25 in 0 : vector<8x8xf32>, vector<8x8xf32> -> vector<16x8xf32>
    %27 = vector.shape_cast %26 : vector<16x8xf32> to vector<1x16x8xf32>
    %28 = vector.extract_strided_slice %22 {offsets = [0, 16], sizes = [8, 8], strides = [1, 1]} : vector<8x48xf32> to vector<8x8xf32>
    %29 = vector.extract_strided_slice %22 {offsets = [0, 24], sizes = [8, 8], strides = [1, 1]} : vector<8x48xf32> to vector<8x8xf32>
    %30 = tpu.concatenate %28, %29 in 0 : vector<8x8xf32>, vector<8x8xf32> -> vector<16x8xf32>
    %31 = vector.shape_cast %30 : vector<16x8xf32> to vector<1x16x8xf32>
    %32 = tpu.concatenate %27, %31 in 0 : vector<1x16x8xf32>, vector<1x16x8xf32> -> vector<2x16x8xf32>
    %33 = vector.extract_strided_slice %22 {offsets = [0, 32], sizes = [8, 8], strides = [1, 1]} : vector<8x48xf32> to vector<8x8xf32>
    %34 = vector.shape_cast %33 : vector<8x8xf32> to vector<1x8x8xf32>
    %35 = vector.extract_strided_slice %22 {offsets = [0, 40], sizes = [8, 8], strides = [1, 1]} : vector<8x48xf32> to vector<8x8xf32>
    %36 = vector.shape_cast %35 : vector<8x8xf32> to vector<1x8x8xf32>
    %37 = tpu.concatenate %34, %36 in 0 : vector<1x8x8xf32>, vector<1x8x8xf32> -> vector<2x8x8xf32>
    %38 = vector.extract_strided_slice %23 {offsets = [0, 0], sizes = [8, 8], strides = [1, 1]} : vector<8x16xf32> to vector<8x8xf32>
    %39 = vector.shape_cast %38 : vector<8x8xf32> to vector<1x8x8xf32>
    %40 = vector.extract_strided_slice %23 {offsets = [0, 8], sizes = [8, 8], strides = [1, 1]} : vector<8x16xf32> to vector<8x8xf32>
    %41 = vector.shape_cast %40 : vector<8x8xf32> to vector<1x8x8xf32>
    %42 = tpu.concatenate %39, %41 in 0 : vector<1x8x8xf32>, vector<1x8x8xf32> -> vector<2x8x8xf32>
    %43 = arith.truncf %32 : vector<2x16x8xf32> to vector<2x16x8xbf16>
    %44 = arith.truncf %37 : vector<2x8x8xf32> to vector<2x8x8xbf16>
    "tpu.trace_start"() <{level = 10 : i32, message = "gqd,gkd->gqk"}> : () -> ()
    %cst_10 = arith.constant dense<0.000000e+00> : vector<2x16x8xf32>
    %45 = tpu.matmul %43, %44, %cst_10 {dimension_numbers = #tpu.dot_dimension_numbers<[2], [2], [1], [1], [0, 0, 0, 1, 1, 1], [0], [0]>} : vector<2x16x8xbf16>, vector<2x8x8xbf16>, vector<2x16x8xf32> -> vector<2x16x8xf32>
    "tpu.trace_stop"() : () -> ()
    %c0_11 = arith.constant 0 : index
    %c0_12 = arith.constant 0 : index
    %46 = vector.load %arg3[%c0_11, %c0_12] : memref<16x8xf32, #tpu.memory_space<vmem>>, vector<16x8xf32>
    %47 = vector.shape_cast %46 : vector<16x8xf32> to vector<1x16x8xf32>
    %48 = vector.broadcast %47 : vector<1x16x8xf32> to vector<2x16x8xf32>
    %49 = arith.addf %45, %48 : vector<2x16x8xf32>
    %cst_13 = arith.constant dense<0xFF800000> : vector<2x16xf32>
    %50 = vector.multi_reduction <maximumf>, %49, %cst_13 [2] : vector<2x16x8xf32> to vector<2x16xf32>
    %51 = vector.shape_cast %50 : vector<2x16xf32> to vector<2x16x1xf32>
    %52 = vector.broadcast %51 : vector<2x16x1xf32> to vector<2x16x8xf32>
    %53 = arith.subf %49, %52 : vector<2x16x8xf32>
    %54 = math.exp %53 : vector<2x16x8xf32>
    %cst_14 = arith.constant dense<0.000000e+00> : vector<2x16xf32>
    %55 = vector.multi_reduction <add>, %54, %cst_14 [2] : vector<2x16x8xf32> to vector<2x16xf32>
    %56 = vector.shape_cast %55 : vector<2x16xf32> to vector<2x16x1xf32>
    %57 = tpu.reciprocal %56 {approx = true} : vector<2x16x1xf32> -> vector<2x16x1xf32>
    %58 = vector.broadcast %57 : vector<2x16x1xf32> to vector<2x16x8xf32>
    %59 = arith.mulf %54, %58 : vector<2x16x8xf32>
    %60 = arith.truncf %59 : vector<2x16x8xf32> to vector<2x16x8xbf16>
    %61 = arith.truncf %42 : vector<2x8x8xf32> to vector<2x8x8xbf16>
    "tpu.trace_start"() <{level = 10 : i32, message = "gqk,gkd->gqd"}> : () -> ()
    %cst_15 = arith.constant dense<0.000000e+00> : vector<2x16x8xf32>
    %62 = tpu.matmul %60, %61, %cst_15 {dimension_numbers = #tpu.dot_dimension_numbers<[2], [1], [1], [2], [0, 0, 0, 1, 1, 2], [0], [0]>} : vector<2x16x8xbf16>, vector<2x8x8xbf16>, vector<2x16x8xf32> -> vector<2x16x8xf32>
    "tpu.trace_stop"() : () -> ()
    %63 = vector.extract_strided_slice %62 {offsets = [0, 0, 0], sizes = [1, 8, 8], strides = [1, 1, 1]} : vector<2x16x8xf32> to vector<1x8x8xf32>
    %64 = vector.shape_cast %63 : vector<1x8x8xf32> to vector<8x8xf32>
    %65 = vector.extract_strided_slice %62 {offsets = [0, 8, 0], sizes = [1, 8, 8], strides = [1, 1, 1]} : vector<2x16x8xf32> to vector<1x8x8xf32>
    %66 = vector.shape_cast %65 : vector<1x8x8xf32> to vector<8x8xf32>
    %67 = vector.extract_strided_slice %62 {offsets = [1, 0, 0], sizes = [1, 8, 8], strides = [1, 1, 1]} : vector<2x16x8xf32> to vector<1x8x8xf32>
    %68 = vector.shape_cast %67 : vector<1x8x8xf32> to vector<8x8xf32>
    %69 = vector.extract_strided_slice %62 {offsets = [1, 8, 0], sizes = [1, 8, 8], strides = [1, 1, 1]} : vector<2x16x8xf32> to vector<1x8x8xf32>
    %70 = vector.shape_cast %69 : vector<1x8x8xf32> to vector<8x8xf32>
    %71 = tpu.concatenate %64, %66, %68, %70 in 1 : vector<8x8xf32>, vector<8x8xf32>, vector<8x8xf32>, vector<8x8xf32> -> vector<8x32xf32>
    %72 = arith.truncf %71 : vector<8x32xf32> to vector<8x32xbf16>
    %c0_16 = arith.constant 0 : index
    %c0_17 = arith.constant 0 : index
    %73 = vector.load %arg6[%c0_16, %c0_17] : memref<32x32xbf16, #tpu.memory_space<vmem>>, vector<32x32xbf16>
    %cst_18 = arith.constant dense<0.000000e+00> : vector<8x32xf32>
    %74 = tpu.matmul %72, %73, %cst_18 {dimension_numbers = #tpu.dot_dimension_numbers<[1], [0], [0], [1], [0, 0, 1, 1], [], []>} : vector<8x32xbf16>, vector<32x32xbf16>, vector<8x32xf32> -> vector<8x32xf32>
    %75 = arith.addf %0, %74 : vector<8x32xf32>
    %76 = arith.mulf %75, %75 : vector<8x32xf32>
    %cst_19 = arith.constant dense<0.000000e+00> : vector<8xf32>
    %77 = vector.multi_reduction <add>, %76, %cst_19 [1] : vector<8x32xf32> to vector<8xf32>
    %78 = vector.shape_cast %77 : vector<8xf32> to vector<8x1xf32>
    %cst_20 = arith.constant 3.200000e+01 : f32
    %79 = vector.broadcast %cst_20 : f32 to vector<8x1xf32>
    %80 = arith.divf %78, %79 : vector<8x1xf32>
    %cst_21 = arith.constant 9.99999997E-7 : f32
    %81 = vector.broadcast %cst_21 : f32 to vector<8x1xf32>
    %82 = arith.addf %80, %81 : vector<8x1xf32>
    %83 = math.rsqrt %82 : vector<8x1xf32>
    %84 = vector.broadcast %83 : vector<8x1xf32> to vector<8x32xf32>
    %85 = arith.mulf %75, %84 : vector<8x32xf32>
    %86 = arith.truncf %85 : vector<8x32xf32> to vector<8x32xbf16>
    %c0_22 = arith.constant 0 : index
    %c0_23 = arith.constant 0 : index
    %87 = vector.load %arg7[%c0_22, %c0_23] : memref<32x128xbf16, #tpu.memory_space<vmem>>, vector<32x128xbf16>
    %cst_24 = arith.constant dense<0.000000e+00> : vector<8x128xf32>
    %88 = tpu.matmul %86, %87, %cst_24 {dimension_numbers = #tpu.dot_dimension_numbers<[1], [0], [0], [1], [0, 0, 1, 1], [], []>} : vector<8x32xbf16>, vector<32x128xbf16>, vector<8x128xf32> -> vector<8x128xf32>
    %89 = vector.extract_strided_slice %88 {offsets = [0, 0], sizes = [8, 64], strides = [1, 1]} : vector<8x128xf32> to vector<8x64xf32>
    %90 = vector.extract_strided_slice %88 {offsets = [0, 64], sizes = [8, 64], strides = [1, 1]} : vector<8x128xf32> to vector<8x64xf32>
    %cst_25 = arith.constant 0.000000e+00 : f32
    %91 = vector.broadcast %cst_25 : f32 to vector<8x64xf32>
    %92 = arith.subf %91, %89 : vector<8x64xf32>
    %93 = math.exp %92 : vector<8x64xf32>
    %cst_26 = arith.constant 1.000000e+00 : f32
    %94 = vector.broadcast %cst_26 : f32 to vector<8x64xf32>
    %95 = arith.addf %94, %93 : vector<8x64xf32>
    %96 = tpu.reciprocal %95 {approx = true} : vector<8x64xf32> -> vector<8x64xf32>
    %97 = arith.mulf %89, %96 : vector<8x64xf32>
    %98 = arith.mulf %97, %90 : vector<8x64xf32>
    %99 = arith.truncf %98 : vector<8x64xf32> to vector<8x64xbf16>
    %c0_27 = arith.constant 0 : index
    %c0_28 = arith.constant 0 : index
    %100 = vector.load %arg8[%c0_27, %c0_28] : memref<64x32xbf16, #tpu.memory_space<vmem>>, vector<64x32xbf16>
    %cst_29 = arith.constant dense<0.000000e+00> : vector<8x32xf32>
    %101 = tpu.matmul %99, %100, %cst_29 {dimension_numbers = #tpu.dot_dimension_numbers<[1], [0], [0], [1], [0, 0, 1, 1], [], []>} : vector<8x64xbf16>, vector<64x32xbf16>, vector<8x32xf32> -> vector<8x32xf32>
    %102 = arith.addf %75, %101 : vector<8x32xf32>
    %c0_30 = arith.constant 0 : index
    %c0_31 = arith.constant 0 : index
    %103 = vector.load %arg9[%c0_30, %c0_31] : memref<8x32xf32, #tpu.memory_space<vmem>>, vector<8x32xf32>
    tpu.vector_store %arg9[%c0_30, %c0_31], %102 {strides = array<i32>} : memref<8x32xf32, #tpu.memory_space<vmem>>, vector<8x32xf32>,
    return
  }
  func.func @transform_0(%arg0: i32) -> (i32, i32) {
    %c0_i32 = arith.constant 0 : i32
    %c0_i32_0 = arith.constant 0 : i32
    return %arg0, %c0_i32 : i32, i32
  }
  func.func @transform_1(%arg0: i32) -> (i32, i32) {
    %c0_i32 = arith.constant 0 : i32
    %c0_i32_0 = arith.constant 0 : i32
    %c0_i32_1 = arith.constant 0 : i32
    return %c0_i32, %c0_i32_0 : i32, i32
  }
  func.func @transform_2(%arg0: i32) -> (i32, i32) {
    %c0_i32 = arith.constant 0 : i32
    %c0_i32_0 = arith.constant 0 : i32
    %c0_i32_1 = arith.constant 0 : i32
    return %c0_i32, %c0_i32_0 : i32, i32
  }
  func.func @transform_3(%arg0: i32) -> (i32, i32) {
    %c0_i32 = arith.constant 0 : i32
    %c0_i32_0 = arith.constant 0 : i32
    %c0_i32_1 = arith.constant 0 : i32
    return %c0_i32, %c0_i32_0 : i32, i32
  }
  func.func @transform_4(%arg0: i32) -> (i32, i32) {
    %c0_i32 = arith.constant 0 : i32
    %c0_i32_0 = arith.constant 0 : i32
    %c0_i32_1 = arith.constant 0 : i32
    return %c0_i32, %c0_i32_0 : i32, i32
  }
  func.func @transform_5(%arg0: i32) -> (i32, i32) {
    %c0_i32 = arith.constant 0 : i32
    %c0_i32_0 = arith.constant 0 : i32
    %c0_i32_1 = arith.constant 0 : i32
    return %c0_i32, %c0_i32_0 : i32, i32
  }
  func.func @transform_6(%arg0: i32) -> (i32, i32) {
    %c0_i32 = arith.constant 0 : i32
    %c0_i32_0 = arith.constant 0 : i32
    %c0_i32_1 = arith.constant 0 : i32
    return %c0_i32, %c0_i32_0 : i32, i32
  }
  func.func @transform_7(%arg0: i32) -> (i32, i32) {
    %c0_i32 = arith.constant 0 : i32
    %c0_i32_0 = arith.constant 0 : i32
    %c0_i32_1 = arith.constant 0 : i32
    return %c0_i32, %c0_i32_0 : i32, i32
  }
  func.func @transform_8(%arg0: i32) -> (i32, i32) {
    %c0_i32 = arith.constant 0 : i32
    %c0_i32_0 = arith.constant 0 : i32
    return %arg0, %c0_i32 : i32, i32
  }
}

</mosaic_0001>

<bundles_post_ra>
// kernel: tpu_custom_call.1
= control target key start
LH: loop header
LB: loop body
LE: loop exit
PB: predicated region body
PF: predicated region fallthrough
CT: control target
= control target key end

     0   :  { %13 = vsyncpa [#allocation3], 0  ;;  %s1577_s0 = inlined_call_operand.vmem [shape: f32[16,32], index: 0, kind: input, shape index: {}]   ;;  %s1578_s1 = inlined_call_operand.hbm [shape: f32[8,96], index: 1, kind: input, shape index: {}]   ;;  %s1579_s2 = inlined_call_operand.vmem [shape: f32[16,8], index: 2, kind: input, shape index: {}]   ;;  %s1580_s3 = inlined_call_operand.vmem [shape: bf16[32,128], index: 3, kind: input, shape index: {}]   ;;  %s1581_s4 = inlined_call_operand.vmem [shape: f32[1,128], index: 4, kind: input, shape index: {}]   ;;  %s1582_s5 = inlined_call_operand.vmem [shape: bf16[32,32], index: 5, kind: input, shape index: {}]   ;;  %s1583_s6 = inlined_call_operand.vmem [shape: bf16[32,128], index: 6, kind: input, shape index: {}]   ;;  %s1584_s7 = inlined_call_operand.vmem [shape: bf16[64,32], index: 7, kind: input, shape index: {}]   ;;  %s1585_s8 = inlined_call_operand.hbm [shape: f32[16,32], index: 8, kind: output, shape index: {}]  }
   0x1   :  { %14 = vsyncpa [#allocation4], 0 }
   0x2   :  { %16 = vsyncpa [#allocation4 + $0x1], 0  ;;  %s1354_s27 = smov 0   ;;  %s1356_s28 = smov 0  }
   0x3   :  { %s1358_s29 = smov 0   ;;  %s1360_s30 = smov 0  }
   0x4 LB: > { %s1375_s9 = sadd.s32 4294967295, %s1294_s30   ;;  %s991_s10 = sadd.s32 4294967294, %s1294_s30   ;;  %s1294_s30 = sphi %s1360_s30, %s1593_s30   ;;  %s1290_s29 = sphi %s1358_s29, %s1592_s29   ;;  %s1286_s28 = sphi %s1356_s28, %s1591_s28   ;;  %s1282_s27 = sphi %s1354_s27, %s1590_s27  }
   0x5   : > { %s1379_s11 = sadd.s32 1, %s1294_s30   ;;  %s202_s12 = sadd.s32 1, %s1290_s29 }
   0x6   : > { %s199_s13 = ssub.s32 %s1294_s30, %s1379_s11  ;;  %p212_p0 = scmp.ne.s32.totalorder %s1290_s29, %s1286_s28 }
   0x7   : > { %p200_p1 = scmp.eq.s32.totalorder %s199_s13, 0  ;;  %p213_p2 = scmp.eq.s32.totalorder %s1375_s9, 1 }
   0x8   : > { %p218_p3 = scmp.ne.s32.totalorder %s1286_s28, %s1282_s27  ;;  %p219_p4 = scmp.eq.s32.totalorder %s991_s10, 1 }
   0x9   : > { %s1390_s14 = scalar_select %p200_p1, %s1290_s29, %s202_s12  }
   0xa   : > { %p1392_p5 = por %p213_p2, %p212_p0  ;;  %p1396_p6 = por %p219_p4, %p218_p3 }
   0xb   : > { %p992_p7 = scmp.ge.s32.totalorder %s1294_s30, 1  ;;  %p226_p8 = scmp.lt.s32.totalorder %s1294_s30, 3 }
   0xc   : > { %s1587_s16 = scalar_select %p1396_p6, 1, 0 }
   0xd   : > { %p1118_p9 = scmp.eq.s32.totalorder %s1375_s9, 0  ;;  %p1403_p10 = pnand %p992_p7, %p226_p8 }
   0xe   : > { %s1296_s18 = smov [#allocation2]  }
   0xf   : > { %s239_s19 = sshll.u32 %s1296_s18, 4  ;;  %p1110_p11 = pneg %p1403_p10  ;;  %s240_s19 = int_to_ptr.vmem [resolvable:$true] %s239_s19 }
  0x10   : > { %s1215_s20 = scalar_lea.vmem %s240_s19, 128  ;;  %p1223_p3 = scmp.lt.s32.totalorder %s240_s19, %s240_s19 }
  0x11   : > { %p1111_p12 = pnand %p1118_p9, %p1110_p11  ;;  %p1216_p0 = scmp.ne.s32.totalorder %s240_s19, %s1215_s20 }
  0x12   : > { %p1224_p4 = scmp.lt.s32.totalorder %s1215_s20, %s1215_s20 }
  0x13   : > { %p1206_p13 = pneg %p1111_p12 }
  0x14   : > { %p1225_p6 = por %p1224_p4, %p1223_p3 }
  0x15   : > { %p1218_p1 = pnand %p1216_p0, %p1206_p13 }
  0x17   : > { %p1219_p2 = pneg %p1218_p1 }
  0x19   : > { %p1226_p7 = pnand %p1225_p6, %p1219_p2 }
  0x1b   : > { %1229 = shalt.err (!%p1226_p7)
}
  0x1c   : > { %1113 = dma.hbm_to_vmem [thread:$0]  (!%p1111_p12), %s1578_s1, 128, %s240_s19, [#allocation3]  }
  0x1d   : > { %277 = sbr.rel (%p1403_p10) target bundleno = 2466 (0x9a2), region = 52 }
  0x22   : > { %1273 = dma.done.wait (%p1118_p9), [#allocation3], 128  }
  0x23   : > { %1275 = vsyncadd (%p1118_p9), [#allocation3], 4294967168  ;;  %p310_p8 = scmp.lt.s32.totalorder %s1375_s9, 1  ;;  %vm317_vm0 = vcmask 261120   ;;  %v1170_v3 = vld [vmem:[%s1580_s3 + $0x8] sm:$0xff]   ;;  %v1297_v4 = vmov 0.0  }
  0x24   : > { %1044 = vmatprep.subr.bf16.mxu0 %v1297_v4  ;;  %vm1298_vm1 = vmmov 0   ;;  %v1171_v5 = vld [vmem:[%s1580_s3] sm:$0xff]   ;;  %1052 = vmatprep.subr.bf16.mxu1 %v1297_v4  ;;  %s1299_s21 = smov 80   ;;  %s1300_s22 = smov 120   ;;  %vm423_vm2 = vcmask 64512   ;;  %v419_v39 = vld [vmem:[%s1579_s2 + $0x8] sm:$0xff] }
  0x25   : > { %s311_s23 = scalar_select %p310_p8, %s1375_s9, 1  ;;  %1048 = vmatprep.mubr.msk.bf16.mxu0 %vm1298_vm1, %v1297_v4  ;;  %1045 = vmatpush3.bf16.msra.mxu0 %v1170_v3  ;;  %v999_v12 = vld [vmem:[%s1581_s4] ss:$0 sm:$0xff]  ;;  %vm575_vm3 = vcmask 1043456   ;;  %vm683_vm4 = vcmask 130048   ;;  %vm685_vm5 = vcmask 195584  }
  0x26   : > { %1046 = vmatprep.subr.bf16.mxu0 %v1297_v4  ;;  %1054 = vmatprep.mubr.msk.bf16.mxu1 %vm1298_vm1, %v1297_v4  ;;  %v393_v14 = vld [vmem:[#allocation2] sm:$0xff]  ;;  %s1303_s13 = smov 32   ;;  %vm860_vm6 = vcmask 523264   ;;  %s1019_s26 = sshll.u32 %s1375_s9, 7 }
  0x27   : > { %s998_s24 = sshll.u32 %s311_s23, 3  ;;  %s1301_s23 = smov 96   ;;  %v418_v35 = vld [vmem:[%s1579_s2] sm:$0xff] }
  0x28   : > { %s313_s10 = scalar_lea.vmem %s1577_s0, %s998_s24  ;;  %s1302_s24 = smov 112  }
  0x29   : > { %v1425_v0 = vld [vmem:[%s313_s10] sm:$0xff]  ;;  %1047 = vmatpush3.bf16.msra.mxu0 %v1171_v5  ;;  %s1535_s18 = scalar_lea.hbm %s1585_s8, %s1019_s26  ;;  %s1308_s20 = smov [#allocation5]  }
  0x2a   : > { %v316_v1 = vmul.f32 %v1425_v0, %v1425_v0  ;;  %1058 = vmatprep.subr.bf16.mxu0 %v1297_v4 }
  0x2c   : > { %v318_v2 = vsel %vm317_vm0, %v316_v1, 0.0 }
  0x2d   : > { %319 = vadd.xlane.f32.xlu0 %v318_v2 }
  0xb6   : > { %v320_v6 = vpop.xlane.xlu0 %319 }
  0xb7   : > { %v322_v7 = vmul.f32 0.03125, %v320_v6 }
  0xb9   : > { %v323_v8 = vadd.f32 1e-06, %v322_v7 }
  0xbb   : > { %1180 = vrsqrt.f32 %v323_v8 }
  0xc8   : > { %v1181_v9 = vpop.eup %1180 }
  0xc9   : > { %v325_v10 = vmul.f32 %v1181_v9, %v1425_v0 }
  0xcb   : > { %v326_v11 = vpack.c.bf16 %v325_v10, %v325_v10 }
  0xcd   : > { %1049 = vmatmul.mubr.msk.bf16.vlgmr.msra.gmra.mxu0 %vm317_vm0, %v326_v11 }
  0xce   : > { %1060 = vmatprep.mubr.msk.bf16.mxu0 %vm1298_vm1, %v1297_v4 }
 0x18d   : > { %v387_v13 = vpop.f32.mrf.mxu0 }
 0x18e   : > { %v1451_v15 = vadd.f32 %v999_v12, %v387_v13 }
 0x18f   : > { %v1050_v16 = vpop.f32.mrf.mxu0 }
 0x190   : > { %v394_v17 = vmul.f32 %v393_v14, %v1451_v15  ;;  %v567_v16 = vpack.c.bf16 %v1451_v15, %v1451_v15 }
 0x191   : > { %v390_v18 = vpop.f32.mrf.mxu0 }
 0x192   : > { %396 = vrot.lane.b32.xlu0 %v394_v17, %s1299_s21  ;;  %s1304_s21 = smov 8  }
 0x193   : > { %v1051_v19 = vpop.f32.mrf.mxu0 }
 0x204   : > { %v397_v20 = vpop.permute.xlu0 %396 }
 0x205   : > { %v399_v21 = vadd.f32 %v397_v20, %v394_v17 }
 0x207   : > { %401 = vrot.lane.b32.xlu1 %v399_v21, %s1300_s22  ;;  %v416_v22 = vpack.c.bf16 %v399_v21, %v399_v21 }
 0x20b   : > { %421 = vrot.lane.b32.xlu1 %v416_v22, %s1301_s23 }
 0x279   : > { %v402_v23 = vpop.permute.xlu1 %401 }
 0x27a   : > { %v417_v24 = vpack.c.bf16 %v402_v23, %v402_v23  ;;  %v1165_v26 = vpack.i.bf16 %v402_v23, %v399_v21  ;;  %v414_v28 = vpack.c.bf16 %v402_v23, %v399_v21 }
 0x27c   : > { %472 = vrot.lane.b32.xlu1 %v417_v24, %s1301_s23  ;;  %s1306_s23 = smov 24  }
 0x27d   : > { %v422_v25 = vpop.permute.xlu1 %421 }
 0x27e   : > { %v428_v27 = vsel %vm423_vm2, %v422_v25, 0 }
 0x27f   : > { %1053 = vmatpush3.bf16.xpose.msra.mxu1 %v428_v27 }
 0x280   : > { %1166 = vrot.lane.b32.xlu1 %v1165_v26, %s1302_s24  ;;  %1064 = vmatprep.subr.bf16.mxu1 %v1297_v4  ;;  %s307_s24 = sand.u32 1, %s1286_s28  }
 0x281   : > { %s997_s25 = sshll.u32 %s307_s24, 3  ;;  %s907_s19 = scalar_lea.sflag [#allocation4], %s307_s24 }
 0x282   : > { %s309_s10 = scalar_lea.vmem [#allocation5], %s997_s25 }
 0x283   : > { %s920_s12 = sshll.u32 %s309_s10, 4  ;;  %s1537_s12 = int_to_ptr.vmem [resolvable:$true] %s920_s12 }
 0x284   : > { %s1230_s9 = scalar_lea.vmem %s1537_s12, 128 }
 0x285   : > { %p1231_p6 = scmp.ne.s32.totalorder %s1537_s12, %s1230_s9 }
 0x286   : > { %1055 = vmatmul.mubr.msk.bf16.vlgmr.msra.gmra.mxu1 %vm423_vm2, %v414_v28 }
 0x287   : > { %1066 = vmatprep.mubr.msk.bf16.mxu1 %vm1298_vm1, %v1297_v4  ;;  %p1232_p9 = pnand %p1231_p6, %p1392_p5 }
 0x289   : > { %p1233_p10 = pneg %p1232_p9 }
 0x2ee   : > { %v473_v29 = vpop.permute.xlu1 %472 }
 0x2ef   : > { %v478_v30 = vsel %vm423_vm2, %v473_v29, 0 }
 0x2f0   : > { %1059 = vmatpush3.bf16.xpose.msra.mxu0 %v478_v30 }
 0x2f1   : > { %1070 = vmatprep.subr.bf16.mxu0 %v1297_v4 }
 0x2f2   : > { %v1167_v31 = vpop.permute.xlu1 %1166 }
 0x2f3   : > { %v1169_v32 = vunpack.i.h.bf16 %v1167_v31  ;;  %v1168_v33 = vunpack.i.l.bf16 %v1167_v31 }
 0x2f5   : > { %v415_v34 = vpack.c.bf16 %v1169_v32, %v1168_v33  ;;  %v1172_v32 = vld [vmem:[%s1582_s5 + $0x8] sm:$0xff]  }
 0x2f7   : > { %1061 = vmatmul.mubr.msk.bf16.vlgmr.msra.gmra.mxu0 %vm423_vm2, %v415_v34  ;;  %v1173_v34 = vld [vmem:[%s1582_s5] sm:$0xff]  }
 0x2f8   : > { %1072 = vmatprep.mubr.msk.bf16.mxu0 %vm1298_vm1, %v1297_v4 }
 0x346   : > { %v464_v36 = vpop.f32.mrf.mxu1 }
 0x347   : > { %v465_v37 = vadd.f32 %v464_v36, %v418_v35 }
 0x348   : > { %v1056_v38 = vpop.f32.mrf.mxu1 }
 0x349   : > { %v521_v40 = vsel %vm423_vm2, %v465_v37, -inf }
 0x34a   : > { %522 = vmax.xlane.f32.xlu1 %v521_v40  ;;  %v467_v41 = vpop.f32.mrf.mxu1 }
 0x34b   : > { %v468_v42 = vadd.f32 %v467_v41, %v419_v39 }
 0x34c   : > { %v1057_v43 = vpop.f32.mrf.mxu1 }
 0x34d   : > { %v524_v44 = vsel %vm423_vm2, %v468_v42, -inf }
 0x34e   : > { %525 = vmax.xlane.f32.xlu0 %v524_v44 }
 0x364   : > { %411 = vrot.lane.b32.xlu0 %v1451_v15, %s1300_s22  ;;  %s1305_s22 = smov 16  }
 0x3b7   : > { %v514_v45 = vpop.f32.mrf.mxu0 }
 0x3b8   : > { %v515_v46 = vadd.f32 %v514_v45, %v418_v35 }
 0x3b9   : > { %v1062_v47 = vpop.f32.mrf.mxu0 }
 0x3ba   : > { %v527_v48 = vsel %vm423_vm2, %v515_v46, -inf }
 0x3bb   : > { %528 = vmax.xlane.f32.xlu1 %v527_v48  ;;  %v517_v49 = vpop.f32.mrf.mxu0 }
 0x3bc   : > { %v518_v50 = vadd.f32 %v517_v49, %v419_v39 }
 0x3bd   : > { %v1063_v51 = vpop.f32.mrf.mxu0 }
 0x3be   : > { %v530_v52 = vsel %vm423_vm2, %v518_v50, -inf }
 0x3bf   : > { %531 = vmax.xlane.f32.xlu1 %v530_v52 }
 0x3d3   : > { %v523_v53 = vpop.xlane.xlu1 %522 }
 0x3d4   : > { %v533_v54 = vsub.f32 %v465_v37, %v523_v53 }
 0x3d6   : > { %v537_v55 = vmul.f32 1.442695, %v533_v54 }
 0x3d7   : > { %v526_v56 = vpop.xlane.xlu0 %525 }
 0x3d8   : > { %1182 = vpow2.f32 %v537_v55  ;;  %v534_v57 = vsub.f32 %v468_v42, %v526_v56  ;;  %v1174_v56 = vld [vmem:[%s1583_s6 + $0x8] sm:$0xff]  }
 0x3da   : > { %v539_v58 = vmul.f32 1.442695, %v534_v57  ;;  %v1175_v57 = vld [vmem:[%s1583_s6] sm:$0xff]  }
 0x3db   : > { %v412_v59 = vpop.permute.xlu0 %411 }
 0x3dc   : > { %1184 = vpow2.f32 %v539_v58  ;;  %v568_v60 = vpack.c.bf16 %v412_v59, %v412_v59 }
 0x3de   : > { %621 = vrot.lane.b32.xlu0 %v568_v60, %s1303_s13 }
 0x3e5   : > { %v1183_v61 = vpop.eup %1182 }
 0x3e6   : > { %v545_v62 = vsel %vm423_vm2, %v1183_v61, 0.0 }
 0x3e7   : > { %546 = vadd.xlane.f32.xlu1 %v545_v62 }
 0x3e9   : > { %v1185_v63 = vpop.eup %1184 }
 0x3ea   : > { %v548_v1 = vsel %vm423_vm2, %v1185_v63, 0.0 }
 0x3eb   : > { %549 = vadd.xlane.f32.xlu1 %v548_v1  ;;  %v1177_v1 = vld [vmem:[%s1584_s7 + $0x10] sm:$0xff]  }
 0x444   : > { %v529_v2 = vpop.xlane.xlu1 %528 }
 0x445   : > { %v535_v3 = vsub.f32 %v515_v46, %v529_v2  ;;  %v1178_v2 = vld [vmem:[%s1584_s7 + $0x8] sm:$0xff]  }
 0x447   : > { %v541_v5 = vmul.f32 1.442695, %v535_v3  ;;  %v1179_v3 = vld [vmem:[%s1584_s7] sm:$0xff]  }
 0x448   : > { %v532_v6 = vpop.xlane.xlu1 %531 }
 0x449   : > { %1186 = vpow2.f32 %v541_v5  ;;  %v536_v7 = vsub.f32 %v518_v50, %v532_v6 }
 0x44b   : > { %v543_v8 = vmul.f32 1.442695, %v536_v7 }
 0x44d   : > { %1188 = vpow2.f32 %v543_v8 }
 0x450   : > { %v622_v9 = vpop.permute.xlu0 %621 }
 0x451   : > { %v627_v10 = vsel %vm575_vm3, %v622_v9, 0 }
 0x452   : > { %1071 = vmatpush3.bf16.msra.mxu0 %v627_v10 }
 0x453   : > { %1084 = vmatprep.subr.bf16.mxu0 %v1297_v4 }
 0x456   : > { %v1187_v11 = vpop.eup %1186 }
 0x457   : > { %v551_v12 = vsel %vm423_vm2, %v1187_v11, 0.0 }
 0x458   : > { %552 = vadd.xlane.f32.xlu1 %v551_v12 }
 0x45a   : > { %v1189_v13 = vpop.eup %1188 }
 0x45b   : > { %v554_v14 = vsel %vm423_vm2, %v1189_v13, 0.0 }
 0x45c   : > { %555 = vadd.xlane.f32.xlu1 %v554_v14 }
 0x46d   : > { %570 = vrot.lane.b32.xlu1 %v567_v16, %s1303_s13 }
 0x470   : > { %v547_v17 = vpop.xlane.xlu1 %546 }
 0x474   : > { %v550_v18 = vpop.xlane.xlu1 %549 }
 0x475   : > { %1190 = vrcp.f32 %v550_v18 }
 0x476   : > { %1192 = vrcp.f32 %v547_v17 }
 0x482   : > { %v1191_v20 = vpop.eup %1190 }
 0x483   : > { %v1193_v22 = vpop.eup %1192  ;;  %v562_v23 = vmul.f32 %v1191_v20, %v1185_v63  ;;  %v1176_v63 = vld [vmem:[%s1584_s7 + $0x18] sm:$0xff]  }
 0x484   : > { %v561_v26 = vmul.f32 %v1193_v22, %v1183_v61 }
 0x486   : > { %v565_v27 = vpack.c.bf16 %v562_v23, %v561_v26 }
 0x4e1   : > { %v553_v19 = vpop.xlane.xlu1 %552 }
 0x4e2   : > { %1194 = vrcp.f32 %v553_v19 }
 0x4e5   : > { %v556_v21 = vpop.xlane.xlu1 %555 }
 0x4e6   : > { %1196 = vrcp.f32 %v556_v21 }
 0x4e9   : > { %v571_v24 = vpop.permute.xlu1 %570 }
 0x4ea   : > { %v577_v25 = vsel %vm575_vm3, %v571_v24, 0 }
 0x4eb   : > { %1065 = vmatpush3.bf16.msra.mxu1 %v577_v25 }
 0x4ec   : > { %1076 = vmatprep.subr.bf16.mxu1 %v1297_v4 }
 0x4ee   : > { %1067 = vmatmul.mubr.msk.bf16.vlgmr.msra.gmra.mxu1 %vm423_vm2, %v565_v27 }
 0x4ef   : > { %1080 = vmatprep.mubr.msk.bf16.mxu1 %vm1298_vm1, %v1297_v4  ;;  %v1195_v15 = vpop.eup %1194  ;;  %1077 = vmatpush3.bf16.msra.mxu1 %v1172_v32 }
 0x4f0   : > { %v563_v29 = vmul.f32 %v1195_v15, %v1187_v11  ;;  %1078 = vmatprep.subr.bf16.mxu1 %v1297_v4 }
 0x4f3   : > { %v1197_v28 = vpop.eup %1196  ;;  %1079 = vmatpush3.bf16.msra.mxu1 %v1173_v34 }
 0x4f4   : > { %v564_v30 = vmul.f32 %v1197_v28, %v1189_v13  ;;  %1092 = vmatprep.subr.bf16.mxu1 %v1297_v4 }
 0x4f6   : > { %v566_v31 = vpack.c.bf16 %v564_v30, %v563_v29 }
 0x4f8   : > { %1073 = vmatmul.mubr.msk.bf16.vlgmr.msra.gmra.mxu0 %vm423_vm2, %v566_v31 }
 0x4f9   : > { %1088 = vmatprep.mubr.msk.bf16.mxu0 %vm1298_vm1, %v1297_v4  ;;  %1085 = vmatpush3.bf16.msra.mxu0 %v1174_v56 }
 0x4fa   : > { %1086 = vmatprep.subr.bf16.mxu0 %v1297_v4 }
 0x4fd   : > { %1087 = vmatpush3.bf16.msra.mxu0 %v1175_v57 }
 0x5ae   : > { %v613_v33 = vpop.f32.mrf.mxu1 }
 0x5b0   : > { %v1068_v35 = vpop.f32.mrf.mxu1 }
 0x5b2   : > { %v616_v36 = vpop.f32.mrf.mxu1 }
 0x5b3   : > { %671 = vrot.lane.b32.xlu0 %v616_v36, %s1304_s21  ;;  %s1234_s21 = sshll.u32 %s1308_s20, 4  ;;  %s1235_s21 = int_to_ptr.vmem [resolvable:$false] %s1234_s21 }
 0x5b4   : > { %v1069_v37 = vpop.f32.mrf.mxu1  ;;  %p1237_p11 = scmp.lt.s32.totalorder %s1537_s12, %s1235_s21 }
 0x5b8   : > { %v663_v38 = vpop.f32.mrf.mxu0 }
 0x5b9   : > { %675 = vrot.lane.b32.xlu0 %v663_v38, %s1305_s22  ;;  %s1236_s22 = scalar_lea.vmem %s1235_s21, 256 }
 0x5ba   : > { %v1074_v39 = vpop.f32.mrf.mxu0  ;;  %p1238_p12 = scmp.lt.s32.totalorder %s1236_s22, %s1230_s9 }
 0x5bc   : > { %v666_v40 = vpop.f32.mrf.mxu0  ;;  %p1239_p13 = por %p1238_p12, %p1237_p11 }
 0x5bd   : > { %679 = vrot.lane.b32.xlu0 %v666_v40, %s1306_s23  ;;  %s1307_s23 = smov 64  }
 0x5be   : > { %v1075_v41 = vpop.f32.mrf.mxu0  ;;  %p1240_p0 = pnand %p1239_p13, %p1233_p10 }
 0x625   : > { %v672_v42 = vpop.permute.xlu0 %671 }
 0x626   : > { %v682_v44 = vsel %vm423_vm2, %v613_v33, %v672_v42 }
 0x62b   : > { %v676_v43 = vpop.permute.xlu0 %675 }
 0x62c   : > { %v684_v45 = vsel %vm683_vm4, %v682_v44, %v676_v43 }
 0x62f   : > { %v680_v46 = vpop.permute.xlu0 %679 }
 0x630   : > { %v686_v47 = vsel %vm685_vm5, %v684_v45, %v680_v46 }
 0x631   : > { %v687_v48 = vpack.c.bf16 %v686_v47, %v686_v47 }
 0x633   : > { %1081 = vmatmul.mubr.msk.bf16.vlgmr.msra.gmra.mxu1 %vm317_vm0, %v687_v48 }
 0x634   : > { %1100 = vmatprep.mubr.msk.bf16.mxu1 %vm1298_vm1, %v1297_v4  ;;  %1093 = vmatpush3.bf16.msra.mxu1 %v1176_v63 }
 0x635   : > { %1094 = vmatprep.subr.bf16.mxu1 %v1297_v4 }
 0x638   : > { %1095 = vmatpush3.bf16.msra.mxu1 %v1177_v1 }
 0x639   : > { %1096 = vmatprep.subr.bf16.mxu1 %v1297_v4 }
 0x63c   : > { %1097 = vmatpush3.bf16.msra.mxu1 %v1178_v2 }
 0x63d   : > { %1098 = vmatprep.subr.bf16.mxu1 %v1297_v4 }
 0x640   : > { %1099 = vmatpush3.bf16.msra.mxu1 %v1179_v3 }
 0x6f3   : > { %v741_v49 = vpop.f32.mrf.mxu1 }
 0x6f4   : > { %v747_v50 = vadd.f32 %v741_v49, %v1425_v0 }
 0x6f5   : > { %v1082_v51 = vpop.f32.mrf.mxu1 }
 0x6f6   : > { %v748_v52 = vmul.f32 %v747_v50, %v747_v50 }
 0x6f7   : > { %v744_v53 = vpop.f32.mrf.mxu1 }
 0x6f8   : > { %v749_v54 = vsel %vm317_vm0, %v748_v52, 0.0 }
 0x6f9   : > { %750 = vadd.xlane.f32.xlu1 %v749_v54  ;;  %v1083_v55 = vpop.f32.mrf.mxu1 }
 0x782   : > { %v751_v0 = vpop.xlane.xlu1 %750 }
 0x783   : > { %v752_v58 = vmul.f32 0.03125, %v751_v0 }
 0x785   : > { %v753_v59 = vadd.f32 1e-06, %v752_v58 }
 0x787   : > { %1198 = vrsqrt.f32 %v753_v59 }
 0x794   : > { %v1199_v60 = vpop.eup %1198 }
 0x795   : > { %v755_v61 = vmul.f32 %v1199_v60, %v747_v50 }
 0x797   : > { %v756_v62 = vpack.c.bf16 %v755_v61, %v755_v61 }
 0x799   : > { %1089 = vmatmul.mubr.msk.bf16.vlgmr.msra.gmra.mxu0 %vm317_vm0, %v756_v62 }
 0x859   : > { %v810_v5 = vpop.f32.mrf.mxu0 }
 0x85a   : > { %823 = vrot.lane.b32.xlu0 %v810_v5, %s1307_s23  ;;  %v816_v9 = vsub.f32 0.0, %v810_v5 }
 0x85b   : > { %v1090_v6 = vpop.f32.mrf.mxu0 }
 0x85c   : > { %v817_v10 = vmul.f32 1.442695, %v816_v9 }
 0x85d   : > { %v813_v7 = vpop.f32.mrf.mxu0 }
 0x85e   : > { %1200 = vpow2.f32 %v817_v10 }
 0x85f   : > { %v1091_v8 = vpop.f32.mrf.mxu0 }
 0x86b   : > { %v1201_v11 = vpop.eup %1200 }
 0x86c   : > { %v819_v12 = vadd.f32 1.0, %v1201_v11 }
 0x86e   : > { %1202 = vrcp.f32 %v819_v12 }
 0x87b   : > { %v1203_v4 = vpop.eup %1202 }
 0x87c   : > { %v821_v13 = vmul.f32 %v1203_v4, %v810_v5 }
 0x8cc   : > { %v824_v14 = vpop.permute.xlu0 %823 }
 0x8cd   : > { %v826_v16 = vmul.f32 %v824_v14, %v821_v13 }
 0x8cf   : > { %v827_v17 = vpack.c.bf16 %v826_v16, %v826_v16 }
 0x8d1   : > { %1101 = vmatmul.mubr.msk.bf16.vlgmr.msra.gmra.mxu1 %vm860_vm6, %v827_v17 }
 0x991   : > { %v898_v18 = vpop.f32.mrf.mxu1 }
 0x992   : > { %v904_v19 = vadd.f32 %v898_v18, %v747_v50 }
 0x993   : > { %v1102_v20 = vpop.f32.mrf.mxu1 }
 0x994   : > { %905 = vst.msk [vmem:[%s309_s10] sm:$0xff] %vm317_vm0, %v904_v19 }
 0x995   : > { %v901_v21 = vpop.f32.mrf.mxu1 }
 0x996   : > { %1243 = shalt.err (!%p1240_p0)
}
 0x997   : > { %s1244_s23 = scalar_lea.hbm %s1535_s18, 128  ;;  %s1248_s26 = scalar_lea.hbm %s1585_s8, 256 }
 0x998   : > { %p1245_p1 = scmp.ne.s32.totalorder %s1535_s18, %s1244_s23  ;;  %p1249_p4 = scmp.lt.s32.totalorder %s1535_s18, %s1585_s8 }
 0x999   : > { %p1250_p7 = scmp.lt.s32.totalorder %s1248_s26, %s1244_s23 }
 0x99a   : > { %p1246_p2 = pnand %p1245_p1, %p1392_p5 }
 0x99b   : > { %p1251_p8 = por %p1250_p7, %p1249_p4 }
 0x99c   : > { %p1247_p3 = pneg %p1246_p2 }
 0x99e   : > { %p1252_p6 = pnand %p1251_p8, %p1247_p3 }
 0x9a0   : > { %1255 = shalt.err (!%p1252_p6)
}
 0x9a1   : > { %1108 = dma.vmem_to_hbm [thread:$0]  (%p1392_p5), %s1537_s12, 128, %s1535_s18, %s907_s19   ;;  %v1103_v22 = vpop.f32.mrf.mxu1 }
 0x9a2 PF: > { %p1120_p9 = scmp.ge.s32.totalorder %s1294_s30, 2  ;;  %s932_s17 = sand.u32 1, %s1282_s27  }
 0x9a3   : > { %p1589_p10 = scmp.ne.s32.totalorder %s1587_s16, 0  ;;  %s933_s9 = scalar_lea.sflag [#allocation4], %s932_s17 }
 0x9a5   : > { %p1115_p11 = pnand %p1120_p9, %p1589_p10 }
 0x9a7   : > { %p1116_p12 = pneg %p1115_p11 }
 0x9a9   : > { %1277 = dma.done.wait (%p1116_p12), %s933_s9, 128  }
 0x9aa   : > { %1279 = vsyncadd (%p1116_p12), %s933_s9, 4294967168  ;;  %p19_p13 = scmp.ge.s32.totalorder %s1379_s11, 4   ;;  %s1590_s27 = smov %s1286_s28 }
 0x9ab   : > { %s1591_s28 = smov %s1290_s29  ;;  %s1592_s29 = smov %s1390_s14 }
 0x9ac   : > { %s1593_s30 = smov %s1379_s11  ;;  %21 = sbr.rel (!%p19_p13) target bundleno = 4 (0x4), region = 92 }
 0x9b1   :  { %938 = vsyncpa [#allocation3], 1 }
 0x9b2   :  { %940 = vsyncpa [#allocation3 + $0x1], 1 }
 0x9b3   :  { %941 = vsyncpa [#allocation4], 1 }
 0x9b4   :  { %943 = vsyncpa [#allocation4 + $0x1], 1 }

</bundles_post_ra>
